<compile_context>
chip_gen: v7x
topology: tpu7x:2x2x1
jax: 0.10.0
libtpu: 0.0.40
codegen_flags: <defaults>
</compile_context>

<pallas_src>
import functools

import jax
import jax.numpy as jnp
from jax.experimental import pallas as pl
from jax.experimental.pallas import tpu as pltpu


def _emotion_classifier_kernel(x_ref, wt_ref, b_ref, o_ref, acc_ref, *,
                               seq_len, tile_s, ragged):
    # x_ref  : (TB, TS, H)  streamed input tile
    # wt_ref : (H, Lp)      transposed, lane-padded classifier weight (resident)
    # b_ref  : (1, Lp)      lane-padded classifier bias (resident)
    # o_ref  : (TB, Lp)     lane-dense output block (resident across seq axis)
    # acc_ref: (TB, H) f32  running sum over the sequence axis
    k = pl.program_id(1)
    nk = pl.num_programs(1)

    @pl.when(k == 0)
    def _init():
        acc_ref[...] = jnp.zeros_like(acc_ref)

    def _load():
        x = x_ref[...]
        if x.dtype != jnp.float32:
            x = x.astype(jnp.float32)
        return x

    if ragged:
        # Steady-state streamed path: pure load + add (no mask ops).
        @pl.when(k < nk - 1)
        def _stream_full():
            acc_ref[...] += jnp.sum(_load(), axis=1)

        # Mask garbage out-of-bounds sequence rows ONLY on the final tile.
        @pl.when(k == nk - 1)
        def _stream_tail():
            x = _load()
            s_idx = jax.lax.broadcasted_iota(jnp.int32, x.shape, dimension=1)
            x = jnp.where(k * tile_s + s_idx < seq_len, x, 0.0)
            acc_ref[...] += jnp.sum(x, axis=1)
    else:
        acc_ref[...] += jnp.sum(_load(), axis=1)

    @pl.when(k == nk - 1)
    def _finalize():
        pooled = acc_ref[...] * (1.0 / seq_len)              # mean (scale folded once)
        # dropout(p=0.3) is identity at inference (eval mode).
        # TODO(synk): training-mode stochastic dropout (pltpu.prng_random_bits) not emitted.
        act = jnp.maximum(pooled, 0.0)                       # ReLU
        logits = jnp.dot(act, wt_ref[...],
                         preferred_element_type=jnp.float32)  # (TB, Lp) on the MXU
        o_ref[...] = (logits + b_ref[...]).astype(o_ref.dtype)


def _vmem_budget():
    """Returns (x_streaming_budget_bytes, vmem_limit_cap_bytes), generation-aware."""
    cap = None
    try:
        cap = int(pltpu.get_tpu_info().vmem_capacity_bytes)
    except Exception:
        cap = None
    if cap is None or cap <= 0:
        cap = 64 * 1024 * 1024                      # conservative fallback (v7x-sized)
    if cap >= 96 * 1024 * 1024:                     # v5e / v6e: 128 MiB physical VMEM
        return 48 * 1024 * 1024, (cap * 3) // 4
    # v7x: 64 MiB per TC; leave >= 8 MiB headroom for Mosaic internal scratch.
    return 28 * 1024 * 1024, cap - 8 * 1024 * 1024


def _pick_tile_b(B):
    tb = min(B, 128)
    if B >= 16:
        tb = min(tb, -(-B // 2))          # >= 2 batch blocks so both v7x TCs get work
    if tb >= B:
        return B
    for d in range(tb, 7, -1):            # prefer an 8-aligned divisor of B
        if d % 8 == 0 and B % d == 0:
            return d
    return max(8, (tb // 8) * 8)


def _pick_tile_s(S, tb, H, itemsize, x_budget):
    ts_max = max(8, x_budget // (2 * tb * H * itemsize))
    if S <= ts_max:
        return S, False                   # whole sequence in one tile, no mask
    ts_cap = max(8, (ts_max // 8) * 8)
    for ts in range(ts_cap, 7, -8):       # largest 8-aligned divisor of S that fits
        if S % ts == 0:
            return ts, False
    return ts_cap, (S % ts_cap != 0)      # no clean divisor: mask only the last tile


def emotion_classifier_forward(hidden_state, weight, bias, *,
                               tile_s=None, tile_b=None):
    """hidden_state: (B, S, H)
       weight:       (num_labels, H)  (PyTorch nn.Linear convention)
       bias:         (num_labels,)
       returns logits (B, num_labels) f32
    """
    B, S, H = hidden_state.shape
    L = weight.shape[0]

    # Lane-dense label dim: pad to a multiple of 128, slice back after.
    Lp = ((L + 127) // 128) * 128
    wt = jnp.pad(weight.T.astype(jnp.float32), ((0, 0), (0, Lp - L)))   # (H, Lp)
    b2 = jnp.pad(bias.astype(jnp.float32), (0, Lp - L)).reshape(1, Lp)  # (1, Lp)

    itemsize = jnp.dtype(hidden_state.dtype).itemsize
    x_budget, vmem_cap_limit = _vmem_budget()

    # Batch tile (leading "parallel" grid axis).
    if tile_b is None:
        tb = _pick_tile_b(B)
    else:
        tb = min(tile_b, B)
        if tb < B and tb % 8 != 0:
            tb = max(8, (tb // 8) * 8)

    # Sequence tile (reduction axis, last in the grid).
    if tile_s is None:
        ts, ragged = _pick_tile_s(S, tb, H, itemsize, x_budget)
    else:
        ts = min(tile_s, S)
        if ts < S and ts % 8 != 0:
            ts = max(8, (ts // 8) * 8)
        ragged = (S % ts != 0)

    nb = pl.cdiv(B, tb)
    nk = pl.cdiv(S, ts)

    # VMEM footprint with modest headroom, clamped below the per-chip safe cap.
    need = (2 * tb * ts * H * itemsize        # streamed x tile, double buffered
            + H * Lp * 4                      # resident weight (single buffered)
            + 8 * Lp * 4                      # resident bias (padded sublane tile)
            + 2 * tb * Lp * 4                 # output block
            + tb * H * 4)                     # f32 accumulator scratch
    vmem_limit = int(min(vmem_cap_limit, max(8 * 1024 * 1024, int(1.5 * need))))

    kernel = functools.partial(_emotion_classifier_kernel,
                               seq_len=S, tile_s=ts, ragged=ragged)

    def build(single_buffer_resident):
        def const_spec(shape):
            if single_buffer_resident:
                return pl.BlockSpec(shape, lambda b, k: (0, 0),
                                    pipeline_mode=pl.Buffered(1))
            return pl.BlockSpec(shape, lambda b, k: (0, 0))

        return pl.pallas_call(
            kernel,
            out_shape=jax.ShapeDtypeStruct((B, Lp), jnp.float32),
            grid_spec=pltpu.PrefetchScalarGridSpec(
                num_scalar_prefetch=0,
                grid=(nb, nk),
                in_specs=[
                    pl.BlockSpec((tb, ts, H), lambda b, k: (b, k, 0)),  # streamed
                    const_spec((H, Lp)),                                 # resident
                    const_spec((1, Lp)),                                 # resident
                ],
                out_specs=pl.BlockSpec((tb, Lp), lambda b, k: (b, 0)),   # resident over k
                scratch_shapes=[pltpu.VMEM((tb, H), jnp.float32)],
            ),
            compiler_params=pltpu.CompilerParams(
                dimension_semantics=("parallel", "arbitrary"),
                vmem_limit_bytes=vmem_limit),
        )

    if hasattr(pl, "Buffered"):
        try:
            out = build(True)(hidden_state, wt, b2)
        except Exception:
            out = build(False)(hidden_state, wt, b2)
    else:
        out = build(False)(hidden_state, wt, b2)

    return out[:, :L]


def reference_forward(hidden_state, weight, bias):
    pooled = jnp.mean(hidden_state, axis=1)
    act = jnp.maximum(pooled, 0.0)
    return act @ weight.T + bias


if __name__ == "__main__":
    key = jax.random.PRNGKey(0)
    k_x, k_w, k_b, k_x2, k_x3 = jax.random.split(key, 5)

    # Small shapes consistent with the module: hidden=128, num_labels=7
    B, S, H, L = 8, 16, 128, 7
    hidden_state = jax.random.normal(k_x, (B, S, H), dtype=jnp.float32)
    weight = jax.random.normal(k_w, (L, H), dtype=jnp.float32) * (1.0 / jnp.sqrt(H))
    bias = jax.random.normal(k_b, (L,), dtype=jnp.float32) * 0.01

    ref = reference_forward(hidden_state, weight, bias)

    # Case 1: auto tiling (TS == S, single sequence step, no mask emitted).
    out1 = jax.block_until_ready(emotion_classifier_forward(hidden_state, weight, bias))
    assert out1.shape == (B, L)
    assert jnp.allclose(out1, ref, atol=1e-4, rtol=1e-4), "mismatch (auto tiles)"

    # Case 2: forced sequence tiling (S=16, TS=8 -> 2 pipelined steps, no mask).
    out2 = jax.block_until_ready(
        emotion_classifier_forward(hidden_state, weight, bias, tile_s=8))
    assert jnp.allclose(out2, ref, atol=1e-4, rtol=1e-4), "mismatch (tiled)"

    # Case 3: ragged sequence tail (S=24, TS=16 -> mask only on the last step).
    S2 = 24
    hs2 = jax.random.normal(k_x2, (B, S2, H), dtype=jnp.float32)
    out3 = jax.block_until_ready(
        emotion_classifier_forward(hs2, weight, bias, tile_s=16))
    ref3 = reference_forward(hs2, weight, bias)
    assert out3.shape == (B, L)
    assert jnp.allclose(out3, ref3, atol=1e-4, rtol=1e-4), "mismatch (ragged)"

    # Case 4: batch large enough to split into >=2 parallel batch blocks (v7x megacore).
    B2 = 32
    hs3 = jax.random.normal(k_x3, (B2, S, H), dtype=jnp.float32)
    out4 = jax.block_until_ready(emotion_classifier_forward(hs3, weight, bias))
    ref4 = reference_forward(hs3, weight, bias)
    assert out4.shape == (B2, L)
    assert jnp.allclose(out4, ref4, atol=1e-4, rtol=1e-4), "mismatch (multi batch block)"

    print("KERNEL_OK")
</pallas_src>

<mosaic_0001>
module attributes {stable_mosaic.version = 11 : i64} {
  func.func @_emotion_classifier_kernel(%arg0: i32, %arg1: i32, %arg2: memref<8x16x128xf32, #tpu.memory_space<vmem>>, %arg3: memref<128x128xf32, #tpu.memory_space<vmem>>, %arg4: memref<1x128xf32, #tpu.memory_space<vmem>>, %arg5: memref<8x128xf32, #tpu.memory_space<vmem>>, %arg6: memref<8x128xf32, #tpu.memory_space<vmem>>) attributes {dimension_semantics = [#tpu.dimension_semantics<parallel>, #tpu.dimension_semantics<arbitrary>], iteration_bounds = array<i64: 1, 1>, scalar_prefetch = 0 : i64, scratch_operands = 1 : i64, tpu.core_type = #tpu.core_type<tc>, window_params = [{transform_indices = @transform_0, window_bounds = array<i64: 8, 16, 128>}, {pipeline_mode = #tpu.pipeline_mode<synchronous>, transform_indices = @transform_1, window_bounds = array<i64: 128, 128>}, {pipeline_mode = #tpu.pipeline_mode<synchronous>, transform_indices = @transform_2, window_bounds = array<i64: 1, 128>}, {transform_indices = @transform_3, window_bounds = array<i64: 8, 128>}]} {
    %c0_i32 = arith.constant 0 : i32
    %0 = arith.cmpi eq, %arg1, %c0_i32 : i32
    %1 = arith.extui %0 : i1 to i32
    %c0_i32_0 = arith.constant 0 : i32
    %2 = arith.cmpi ne, %1, %c0_i32_0 : i32
    scf.if %2 {
      %cst_9 = arith.constant 0.000000e+00 : f32
      %11 = vector.broadcast %cst_9 : f32 to vector<8x128xf32>
      %c0_10 = arith.constant 0 : index
      %c0_11 = arith.constant 0 : index
      %12 = vector.load %arg6[%c0_10, %c0_11] : memref<8x128xf32, #tpu.memory_space<vmem>>, vector<8x128xf32>
      tpu.vector_store %arg6[%c0_10, %c0_11], %11 {strides = array<i32>} : memref<8x128xf32, #tpu.memory_space<vmem>>, vector<8x128xf32>,
    } else {
    }
    %c0 = arith.constant 0 : index
    %c0_1 = arith.constant 0 : index
    %3 = vector.load %arg6[%c0, %c0_1] : memref<8x128xf32, #tpu.memory_space<vmem>>, vector<8x128xf32>
    %c0_2 = arith.constant 0 : index
    %c0_3 = arith.constant 0 : index
    %c0_4 = arith.constant 0 : index
    %4 = vector.load %arg2[%c0_2, %c0_3, %c0_4] : memref<8x16x128xf32, #tpu.memory_space<vmem>>, vector<8x16x128xf32>
    %cst = arith.constant dense<0.000000e+00> : vector<8x128xf32>
    %5 = vector.multi_reduction <add>, %4, %cst [1] : vector<8x16x128xf32> to vector<8x128xf32>
    %6 = arith.addf %3, %5 : vector<8x128xf32>
    %c0_5 = arith.constant 0 : index
    %c0_6 = arith.constant 0 : index
    %7 = vector.load %arg6[%c0_5, %c0_6] : memref<8x128xf32, #tpu.memory_space<vmem>>, vector<8x128xf32>
    tpu.vector_store %arg6[%c0_5, %c0_6], %6 {strides = array<i32>} : memref<8x128xf32, #tpu.memory_space<vmem>>, vector<8x128xf32>,
    %c0_i32_7 = arith.constant 0 : i32
    %8 = arith.cmpi eq, %arg1, %c0_i32_7 : i32
    %9 = arith.extui %8 : i1 to i32
    %c0_i32_8 = arith.constant 0 : i32
    %10 = arith.cmpi ne, %9, %c0_i32_8 : i32
    scf.if %10 {
      %c0_9 = arith.constant 0 : index
      %c0_10 = arith.constant 0 : index
      %11 = vector.load %arg6[%c0_9, %c0_10] : memref<8x128xf32, #tpu.memory_space<vmem>>, vector<8x128xf32>
      %cst_11 = arith.constant 6.250000e-02 : f32
      %12 = vector.broadcast %cst_11 : f32 to vector<8x128xf32>
      %13 = arith.mulf %11, %12 : vector<8x128xf32>
      %cst_12 = arith.constant 0.000000e+00 : f32
      %14 = vector.broadcast %cst_12 : f32 to vector<8x128xf32>
      %15 = arith.maximumf %13, %14 : vector<8x128xf32>
      %c0_13 = arith.constant 0 : index
      %c0_14 = arith.constant 0 : index
      %16 = vector.load %arg3[%c0_13, %c0_14] : memref<128x128xf32, #tpu.memory_space<vmem>>, vector<128x128xf32>
      %cst_15 = arith.constant dense<0.000000e+00> : vector<8x128xf32>
      %17 = tpu.matmul %15, %16, %cst_15 {dimension_numbers = #tpu.dot_dimension_numbers<[1], [0], [0], [1], [0, 0, 1, 1], [], []>} : vector<8x128xf32>, vector<128x128xf32>, vector<8x128xf32> -> vector<8x128xf32>
      %c0_16 = arith.constant 0 : index
      %c0_17 = arith.constant 0 : index
      %18 = vector.load %arg4[%c0_16, %c0_17] : memref<1x128xf32, #tpu.memory_space<vmem>>, vector<1x128xf32>
      %19 = vector.broadcast %18 : vector<1x128xf32> to vector<8x128xf32>
      %20 = arith.addf %17, %19 : vector<8x128xf32>
      %c0_18 = arith.constant 0 : index
      %c0_19 = arith.constant 0 : index
      %21 = vector.load %arg5[%c0_18, %c0_19] : memref<8x128xf32, #tpu.memory_space<vmem>>, vector<8x128xf32>
      tpu.vector_store %arg5[%c0_18, %c0_19], %20 {strides = array<i32>} : memref<8x128xf32, #tpu.memory_space<vmem>>, vector<8x128xf32>,
    } else {
    }
    return
  }
  func.func @transform_0(%arg0: i32, %arg1: i32) -> (i32, i32, i32) {
    %c0_i32 = arith.constant 0 : i32
    %c0_i32_0 = arith.constant 0 : i32
    return %arg0, %arg1, %c0_i32 : i32, i32, i32
  }
  func.func @transform_1(%arg0: i32, %arg1: i32) -> (i32, i32) {
    %c0_i32 = arith.constant 0 : i32
    %c0_i32_0 = arith.constant 0 : i32
    %c0_i32_1 = arith.constant 0 : i32
    return %c0_i32, %c0_i32_0 : i32, i32
  }
  func.func @transform_2(%arg0: i32, %arg1: i32) -> (i32, i32) {
    %c0_i32 = arith.constant 0 : i32
    %c0_i32_0 = arith.constant 0 : i32
    %c0_i32_1 = arith.constant 0 : i32
    return %c0_i32, %c0_i32_0 : i32, i32
  }
  func.func @transform_3(%arg0: i32, %arg1: i32) -> (i32, i32) {
    %c0_i32 = arith.constant 0 : i32
    %c0_i32_0 = arith.constant 0 : i32
    return %arg0, %c0_i32 : i32, i32
  }
}

module attributes {stable_mosaic.version = 11 : i64} {
  func.func @_emotion_classifier_kernel(%arg0: i32, %arg1: i32, %arg2: memref<8x16x128xf32, #tpu.memory_space<vmem>>, %arg3: memref<128x128xf32, #tpu.memory_space<vmem>>, %arg4: memref<1x128xf32, #tpu.memory_space<vmem>>, %arg5: memref<8x128xf32, #tpu.memory_space<vmem>>, %arg6: memref<8x128xf32, #tpu.memory_space<vmem>>) attributes {dimension_semantics = [#tpu.dimension_semantics<parallel>, #tpu.dimension_semantics<arbitrary>], iteration_bounds = array<i64: 1, 1>, scalar_prefetch = 0 : i64, scratch_operands = 1 : i64, tpu.core_type = #tpu.core_type<tc>, window_params = [{transform_indices = @transform_0, window_bounds = array<i64: 8, 16, 128>}, {pipeline_mode = #tpu.pipeline_mode<synchronous>, transform_indices = @transform_1, window_bounds = array<i64: 128, 128>}, {pipeline_mode = #tpu.pipeline_mode<synchronous>, transform_indices = @transform_2, window_bounds = array<i64: 1, 128>}, {transform_indices = @transform_3, window_bounds = array<i64: 8, 128>}]} {
    %c0_i32 = arith.constant 0 : i32
    %0 = arith.cmpi eq, %arg1, %c0_i32 : i32
    %1 = arith.extui %0 : i1 to i32
    %c0_i32_0 = arith.constant 0 : i32
    %2 = arith.cmpi ne, %1, %c0_i32_0 : i32
    scf.if %2 {
      %cst_9 = arith.constant 0.000000e+00 : f32
      %11 = vector.broadcast %cst_9 : f32 to vector<8x128xf32>
      %c0_10 = arith.constant 0 : index
      %c0_11 = arith.constant 0 : index
      %12 = vector.load %arg6[%c0_10, %c0_11] : memref<8x128xf32, #tpu.memory_space<vmem>>, vector<8x128xf32>
      tpu.vector_store %arg6[%c0_10, %c0_11], %11 {strides = array<i32>} : memref<8x128xf32, #tpu.memory_space<vmem>>, vector<8x128xf32>,
    } else {
    }
    %c0 = arith.constant 0 : index
    %c0_1 = arith.constant 0 : index
    %3 = vector.load %arg6[%c0, %c0_1] : memref<8x128xf32, #tpu.memory_space<vmem>>, vector<8x128xf32>
    %c0_2 = arith.constant 0 : index
    %c0_3 = arith.constant 0 : index
    %c0_4 = arith.constant 0 : index
    %4 = vector.load %arg2[%c0_2, %c0_3, %c0_4] : memref<8x16x128xf32, #tpu.memory_space<vmem>>, vector<8x16x128xf32>
    %cst = arith.constant dense<0.000000e+00> : vector<8x128xf32>
    %5 = vector.multi_reduction <add>, %4, %cst [1] : vector<8x16x128xf32> to vector<8x128xf32>
    %6 = arith.addf %3, %5 : vector<8x128xf32>
    %c0_5 = arith.constant 0 : index
    %c0_6 = arith.constant 0 : index
    %7 = vector.load %arg6[%c0_5, %c0_6] : memref<8x128xf32, #tpu.memory_space<vmem>>, vector<8x128xf32>
    tpu.vector_store %arg6[%c0_5, %c0_6], %6 {strides = array<i32>} : memref<8x128xf32, #tpu.memory_space<vmem>>, vector<8x128xf32>,
    %c0_i32_7 = arith.constant 0 : i32
    %8 = arith.cmpi eq, %arg1, %c0_i32_7 : i32
    %9 = arith.extui %8 : i1 to i32
    %c0_i32_8 = arith.constant 0 : i32
    %10 = arith.cmpi ne, %9, %c0_i32_8 : i32
    scf.if %10 {
      %c0_9 = arith.constant 0 : index
      %c0_10 = arith.constant 0 : index
      %11 = vector.load %arg6[%c0_9, %c0_10] : memref<8x128xf32, #tpu.memory_space<vmem>>, vector<8x128xf32>
      %cst_11 = arith.constant 6.250000e-02 : f32
      %12 = vector.broadcast %cst_11 : f32 to vector<8x128xf32>
      %13 = arith.mulf %11, %12 : vector<8x128xf32>
      %cst_12 = arith.constant 0.000000e+00 : f32
      %14 = vector.broadcast %cst_12 : f32 to vector<8x128xf32>
      %15 = arith.maximumf %13, %14 : vector<8x128xf32>
      %c0_13 = arith.constant 0 : index
      %c0_14 = arith.constant 0 : index
      %16 = vector.load %arg3[%c0_13, %c0_14] : memref<128x128xf32, #tpu.memory_space<vmem>>, vector<128x128xf32>
      %cst_15 = arith.constant dense<0.000000e+00> : vector<8x128xf32>
      %17 = tpu.matmul %15, %16, %cst_15 {dimension_numbers = #tpu.dot_dimension_numbers<[1], [0], [0], [1], [0, 0, 1, 1], [], []>} : vector<8x128xf32>, vector<128x128xf32>, vector<8x128xf32> -> vector<8x128xf32>
      %c0_16 = arith.constant 0 : index
      %c0_17 = arith.constant 0 : index
      %18 = vector.load %arg4[%c0_16, %c0_17] : memref<1x128xf32, #tpu.memory_space<vmem>>, vector<1x128xf32>
      %19 = vector.broadcast %18 : vector<1x128xf32> to vector<8x128xf32>
      %20 = arith.addf %17, %19 : vector<8x128xf32>
      %c0_18 = arith.constant 0 : index
      %c0_19 = arith.constant 0 : index
      %21 = vector.load %arg5[%c0_18, %c0_19] : memref<8x128xf32, #tpu.memory_space<vmem>>, vector<8x128xf32>
      tpu.vector_store %arg5[%c0_18, %c0_19], %20 {strides = array<i32>} : memref<8x128xf32, #tpu.memory_space<vmem>>, vector<8x128xf32>,
    } else {
    }
    return
  }
  func.func @transform_0(%arg0: i32, %arg1: i32) -> (i32, i32, i32) {
    %c0_i32 = arith.constant 0 : i32
    %c0_i32_0 = arith.constant 0 : i32
    return %arg0, %arg1, %c0_i32 : i32, i32, i32
  }
  func.func @transform_1(%arg0: i32, %arg1: i32) -> (i32, i32) {
    %c0_i32 = arith.constant 0 : i32
    %c0_i32_0 = arith.constant 0 : i32
    %c0_i32_1 = arith.constant 0 : i32
    return %c0_i32, %c0_i32_0 : i32, i32
  }
  func.func @transform_2(%arg0: i32, %arg1: i32) -> (i32, i32) {
    %c0_i32 = arith.constant 0 : i32
    %c0_i32_0 = arith.constant 0 : i32
    %c0_i32_1 = arith.constant 0 : i32
    return %c0_i32, %c0_i32_0 : i32, i32
  }
  func.func @transform_3(%arg0: i32, %arg1: i32) -> (i32, i32) {
    %c0_i32 = arith.constant 0 : i32
    %c0_i32_0 = arith.constant 0 : i32
    return %arg0, %c0_i32 : i32, i32
  }
}

</mosaic_0001>

<bundles_post_ra>
// kernel: tpu_custom_call.1
= control target key start
LH: loop header
LB: loop body
LE: loop exit
PB: predicated region body
PF: predicated region fallthrough
CT: control target
= control target key end

     0   :  { %8 = vsyncpa [#allocation4], 0  ;;  %s513_s0 = inlined_call_operand.hbm [shape: f32[8,16,128], index: 0, kind: input, shape index: {}]   ;;  %s514_s1 = inlined_call_operand.hbm [shape: f32[128,128], index: 1, kind: input, shape index: {}]   ;;  %s515_s2 = inlined_call_operand.vmem [shape: f32[1,128], index: 2, kind: input, shape index: {}]   ;;  %s516_s3 = inlined_call_operand.hbm [shape: f32[8,128], index: 3, kind: output, shape index: {}]  }
   0x1   :  { %9 = vsyncpa [#allocation7], 0 }
   0x2   :  { %10 = vsyncpa [#allocation5], 0  ;;  %s419_s12 = smov [#allocation3]   ;;  %s347_s16 = scalar_lea.hbm %s513_s0, 2048 }
   0x3   :  { %s16_s13 = sshll.u32 %s419_s12, 4  ;;  %p348_p0 = scmp.ne.s32.totalorder %s513_s0, %s347_s16  ;;  %s17_s13 = int_to_ptr.vmem [resolvable:$true] %s16_s13 }
   0x4   :  { %p351_p1 = scmp.lt.u32.totalorder %s347_s16, %s513_s0 }
   0x6   :  { %p353_p2 = pnand %p351_p1, %p348_p0 }
   0x8   :  { %356 = shalt.err (!%p353_p2)
}
   0x9   :  { %s357_s21 = scalar_lea.vmem %s17_s13, 2048  ;;  %p362_p4 = scmp.lt.s32.totalorder %s17_s13, %s17_s13 }
   0xa   :  { %p358_p3 = scmp.ne.s32.totalorder %s17_s13, %s357_s21  ;;  %p363_p5 = scmp.lt.s32.totalorder %s357_s21, %s357_s21 }
   0xc   :  { %p364_p6 = por %p363_p5, %p362_p4 }
   0xe   :  { %p365_p7 = pnand %p364_p6, %p358_p3 }
  0x10   :  { %368 = shalt.err (!%p365_p7)
}
  0x11   :  { %s420_s22 = smov 128   ;;  %s421_s23 = smov 8  }
  0x12   :  { %22 = dma.hbm_to_vmem [thread:$0]  %s513_s0, 2048, %s17_s13, [#allocation4], %s420_s22, %s420_s22, %s421_s23  }
  0x13   :  { %s422_s26 = smov [#allocation6]   ;;  %s369_s30 = scalar_lea.hbm %s514_s1, 2048 }
  0x14   :  { %s28_s27 = sshll.u32 %s422_s26, 4  ;;  %p370_p8 = scmp.ne.s32.totalorder %s514_s1, %s369_s30  ;;  %s29_s27 = int_to_ptr.vmem [resolvable:$true] %s28_s27 }
  0x15   :  { %p373_p9 = scmp.lt.u32.totalorder %s369_s30, %s514_s1 }
  0x17   :  { %p375_p10 = pnand %p373_p9, %p370_p8 }
  0x19   :  { %378 = shalt.err (!%p375_p10)
}
  0x1a   :  { %s379_s8 = scalar_lea.vmem %s29_s27, 2048  ;;  %p384_p12 = scmp.lt.s32.totalorder %s29_s27, %s29_s27 }
  0x1b   :  { %p380_p11 = scmp.ne.s32.totalorder %s29_s27, %s379_s8  ;;  %p385_p13 = scmp.lt.s32.totalorder %s379_s8, %s379_s8 }
  0x1d   :  { %p386_p0 = por %p385_p13, %p384_p12 }
  0x1f   :  { %p387_p1 = pnand %p386_p0, %p380_p11 }
  0x21   :  { %390 = shalt.err (!%p387_p1)
}
  0x22   :  { %34 = dma.hbm_to_vmem [thread:$0]  %s514_s1, 2048, %s29_s27, [#allocation7], %s420_s22, %s420_s22, %s421_s23  }
  0x23   :  { %413 = dma.done.wait [#allocation4], 2048  }
  0x24   :  { %414 = vsyncadd [#allocation4], 4294965248 }
  0x25   :  { %415 = dma.done.wait [#allocation7], 2048  }
  0x26   :  { %416 = vsyncadd [#allocation7], 4294965248  ;;  %v423_v0 = vmov 0.0|0.0   ;;  %vm424_vm0 = vmmov 0   ;;  %v425_v1 = vmov 0.0   ;;  %v152_v2 = vld [vmem:[#allocation6] sm:$0xff] }
  0x27   :  { %315 = vmatprep.subr.bf16.mxu0 %v423_v0  ;;  %312 = vmatprep.mubr.msk.f32.mxu0 %vm424_vm0, %v425_v1  ;;  %v153_v3 = vld [vmem:[#allocation6 + $0x8] sm:$0xff]  ;;  %v154_v4 = vld [vmem:[#allocation6 + $0x10] sm:$0xff]  ;;  %v155_v6 = vld [vmem:[#allocation6 + $0x18] sm:$0xff]  ;;  %vm129_vm1 = vcmask 1041409   ;;  %vm131_vm2 = vcmask 1042434   ;;  %vm133_vm3 = vcmask 1043459  }
  0x28   :  { %v316_v5 = vpack.c.bf16 %v153_v3, %v152_v2  ;;  %v156_v7 = vld [vmem:[#allocation6 + $0x20] sm:$0xff]  ;;  %v319_v8 = vpack.c.bf16 %v155_v6, %v154_v4  ;;  %v157_v9 = vld [vmem:[#allocation6 + $0x28] sm:$0xff]  ;;  %v158_v10 = vld [vmem:[#allocation6 + $0x30] sm:$0xff]  ;;  %vm135_vm4 = vcmask 1044484   ;;  %vm137_vm5 = vcmask 1045509   ;;  %s426_s11 = smov [#allocation8]  }
  0x29   :  { %v159_v11 = vld [vmem:[#allocation6 + $0x38] sm:$0xff]  ;;  %v473_v12 = vld [vmem:[#allocation6 + $0x40] sm:$0xff]  ;;  %v475_v13 = vld [vmem:[#allocation6 + $0x48] sm:$0xff]  ;;  %v322_v22 = vpack.c.bf16 %v157_v9, %v156_v7  ;;  %vm139_vm6 = vcmask 1046534   ;;  %vm141_vm7 = vcmask 1047559   ;;  %s252_s12 = sshll.u32 %s426_s11, 4  ;;  %s253_s12 = int_to_ptr.vmem [resolvable:$true] %s252_s12 }
  0x2a   :  { %317 = vmatpush3.bf16.msra.mxu0 %v316_v5  ;;  %v477_v14 = vld [vmem:[#allocation6 + $0x50] sm:$0xff]  ;;  %v479_v15 = vld [vmem:[#allocation6 + $0x58] sm:$0xff]  ;;  %v49_v16 = vld [vmem:[#allocation3] sm:$0xff]  ;;  %v325_v27 = vpack.c.bf16 %v159_v11, %v158_v10  ;;  %v328_v34 = vpack.c.bf16 %v475_v13, %v473_v12  ;;  %s391_s13 = scalar_lea.vmem %s253_s12, 128  ;;  %p396_p3 = scmp.lt.s32.totalorder %s253_s12, %s253_s12 }
  0x2b   :  { %318 = vmatprep.subr.bf16.mxu0 %v423_v0  ;;  %v50_v17 = vld [vmem:[#allocation3 + $0x8] sm:$0xff]  ;;  %v51_v18 = vld [vmem:[#allocation3 + $0x10] sm:$0xff]  ;;  %v52_v19 = vld [vmem:[#allocation3 + $0x18] sm:$0xff]  ;;  %v331_v35 = vpack.c.bf16 %v479_v15, %v477_v14  ;;  %p392_p2 = scmp.ne.s32.totalorder %s253_s12, %s391_s13  ;;  %p397_p4 = scmp.lt.s32.totalorder %s391_s13, %s391_s13 }
  0x2c   :  { %v53_v20 = vld [vmem:[#allocation3 + $0x20] sm:$0xff]  ;;  %v65_v21 = vadd.f32 %v50_v17, %v49_v16  ;;  %v54_v23 = vld [vmem:[#allocation3 + $0x28] sm:$0xff]  ;;  %v55_v24 = vld [vmem:[#allocation3 + $0x30] sm:$0xff]  ;;  %v72_v26 = vadd.f32 %v52_v19, %v51_v18 }
  0x2d   :  { %v56_v25 = vld [vmem:[#allocation3 + $0x38] sm:$0xff]  ;;  %v57_v28 = vld [vmem:[#allocation3 + $0x40] sm:$0xff]  ;;  %v58_v29 = vld [vmem:[#allocation3 + $0x48] sm:$0xff]  ;;  %v79_v32 = vadd.f32 %v54_v23, %v53_v20  ;;  %p398_p5 = por %p397_p4, %p396_p3 }
  0x2e   :  { %320 = vmatpush3.bf16.msra.mxu0 %v319_v8  ;;  %v59_v30 = vld [vmem:[#allocation3 + $0x50] sm:$0xff]  ;;  %v66_v31 = vrot.slane %v65_v21, 4  ;;  %v86_v33 = vadd.f32 %v56_v25, %v55_v24  ;;  %v60_v36 = vld [vmem:[#allocation3 + $0x58] sm:$0xff]  ;;  %v61_v37 = vld [vmem:[#allocation3 + $0x60] sm:$0xff]  ;;  %v73_v39 = vrot.slane %v72_v26, 4  ;;  %v93_v40 = vadd.f32 %v58_v29, %v57_v28 }
  0x2f   :  { %321 = vmatprep.subr.bf16.mxu0 %v423_v0  ;;  %v62_v38 = vld [vmem:[#allocation3 + $0x68] sm:$0xff]  ;;  %v63_v41 = vld [vmem:[#allocation3 + $0x70] sm:$0xff]  ;;  %v64_v42 = vld [vmem:[#allocation3 + $0x78] sm:$0xff]  ;;  %v80_v44 = vrot.slane %v79_v32, 4  ;;  %v100_v46 = vadd.f32 %v60_v36, %v59_v30  ;;  %p399_p6 = pnand %p398_p5, %p392_p2 }
  0x30   :  { %v67_v43 = vadd.f32 %v66_v31, %v65_v21  ;;  %v87_v45 = vrot.slane %v86_v33, 4  ;;  %v74_v47 = vadd.f32 %v73_v39, %v72_v26  ;;  %v94_v48 = vrot.slane %v93_v40, 4  ;;  %v165_v23 = vld [vmem:[#allocation6 + $0x68] sm:$0xff]  ;;  %v167_v39 = vld [vmem:[#allocation6 + $0x78] sm:$0xff] }
  0x31   :  { %v107_v49 = vadd.f32 %v62_v38, %v61_v37  ;;  %v114_v50 = vadd.f32 %v64_v42, %v63_v41  ;;  %v81_v52 = vadd.f32 %v80_v44, %v79_v32  ;;  %v101_v54 = vrot.slane %v100_v46, 4  ;;  %v166_v38 = vld [vmem:[#allocation6 + $0x70] sm:$0xff] }
  0x32   :  { %323 = vmatpush3.bf16.msra.mxu0 %v322_v22  ;;  %v68_v51 = vrot.slane %v67_v43, 2  ;;  %v88_v53 = vadd.f32 %v87_v45, %v86_v33  ;;  %v75_v55 = vrot.slane %v74_v47, 2  ;;  %v95_v56 = vadd.f32 %v94_v48, %v93_v40  ;;  %v164_v22 = vld [vmem:[#allocation6 + $0x60] sm:$0xff] }
  0x33   :  { %324 = vmatprep.subr.bf16.mxu0 %v423_v0  ;;  %v108_v57 = vrot.slane %v107_v49, 4  ;;  %v115_v58 = vrot.slane %v114_v50, 4  ;;  %v82_v60 = vrot.slane %v81_v52, 2  ;;  %v102_v62 = vadd.f32 %v101_v54, %v100_v46 }
  0x34   :  { %v69_v59 = vadd.f32 %v68_v51, %v67_v43  ;;  %v89_v61 = vrot.slane %v88_v53, 2  ;;  %v76_v63 = vadd.f32 %v75_v55, %v74_v47  ;;  %v96_v1 = vrot.slane %v95_v56, 2 }
  0x35   :  { %v109_v2 = vadd.f32 %v108_v57, %v107_v49  ;;  %v116_v3 = vadd.f32 %v115_v58, %v114_v50  ;;  %v83_v5 = vadd.f32 %v82_v60, %v81_v52  ;;  %v103_v7 = vrot.slane %v102_v62, 2 }
  0x36   :  { %326 = vmatpush3.bf16.msra.mxu0 %v325_v27  ;;  %v70_v4 = vrot.slane %v69_v59, 1  ;;  %v90_v6 = vadd.f32 %v89_v61, %v88_v53  ;;  %v77_v8 = vrot.slane %v76_v63, 1  ;;  %v97_v9 = vadd.f32 %v96_v1, %v95_v56 }
  0x37   :  { %327 = vmatprep.subr.bf16.mxu0 %v423_v0  ;;  %v110_v10 = vrot.slane %v109_v2, 2  ;;  %v117_v11 = vrot.slane %v116_v3, 2  ;;  %v84_v13 = vrot.slane %v83_v5, 1  ;;  %v104_v17 = vadd.f32 %v103_v7, %v102_v62 }
  0x38   :  { %v71_v12 = vadd.f32 %v70_v4, %v69_v59  ;;  %v91_v16 = vrot.slane %v90_v6, 1  ;;  %v78_v18 = vadd.f32 %v77_v8, %v76_v63  ;;  %v98_v19 = vrot.slane %v97_v9, 1 }
  0x39   :  { %v111_v20 = vadd.f32 %v110_v10, %v109_v2  ;;  %v118_v21 = vadd.f32 %v117_v11, %v116_v3  ;;  %v85_v24 = vadd.f32 %v84_v13, %v83_v5  ;;  %v105_v26 = vrot.slane %v104_v17, 1 }
  0x3a   :  { %329 = vmatpush3.bf16.msra.mxu0 %v328_v34  ;;  %v92_v25 = vadd.f32 %v91_v16, %v90_v6  ;;  %v99_v27 = vadd.f32 %v98_v19, %v97_v9  ;;  %v130_v30 = vsel %vm129_vm1, %v78_v18, %v71_v12  ;;  %v334_v33 = vpack.c.bf16 %v165_v23, %v164_v22 }
  0x3b   :  { %330 = vmatprep.subr.bf16.mxu0 %v423_v0  ;;  %v112_v28 = vrot.slane %v111_v20, 1  ;;  %v119_v29 = vrot.slane %v118_v21, 1  ;;  %v106_v31 = vadd.f32 %v105_v26, %v104_v17  ;;  %v132_v32 = vsel %vm131_vm2, %v85_v24, %v130_v30 }
  0x3c   :  { %v134_v37 = vsel %vm133_vm3, %v92_v25, %v132_v32  ;;  %v337_v43 = vpack.c.bf16 %v167_v39, %v166_v38 }
  0x3d   :  { %v113_v34 = vadd.f32 %v112_v28, %v111_v20  ;;  %v120_v36 = vadd.f32 %v119_v29, %v118_v21  ;;  %v136_v40 = vsel %vm135_vm4, %v99_v27, %v134_v37 }
  0x3e   :  { %332 = vmatpush3.bf16.msra.mxu0 %v331_v35  ;;  %v138_v41 = vsel %vm137_vm5, %v106_v31, %v136_v40  ;;  %v262_v35 = vld [vmem:[%s515_s2] ss:$0 sm:$0xff] }
  0x3f   :  { %333 = vmatprep.subr.bf16.mxu0 %v423_v0  ;;  %v140_v42 = vsel %vm139_vm6, %v113_v34, %v138_v41 }
  0x40   :  { %v142_v44 = vsel %vm141_vm7, %v120_v36, %v140_v42 }
  0x41   :  { %v150_v14 = vmul.f32 0.0625, %v142_v44 }
  0x42   :  { %335 = vmatpush3.bf16.msra.mxu0 %v334_v33 }
  0x43   :  { %336 = vmatprep.subr.bf16.mxu0 %v423_v0  ;;  %v151_v15 = vmax.f32 %v150_v14, 0.0 }
  0x46   :  { %338 = vmatpush3.bf16.msra.mxu0 %v337_v43 }
  0x49   :  { %313 = vmatmul.mubr.f32.vlgmr.msra.gmra.mrb[0].mxu0 %v151_v15 }
 0x11c   :  { %v241_v45 = vpop.f32.mrb[0].mxu0 }
 0x11d   :  { %v242_v46 = vadd.f32 %v262_v35, %v241_v45  ;;  %v314_v47 = vpop.f32.mrb[1].mxu0 }
 0x11f   :  { %245 = vst [vmem:[#allocation8] sm:$0xff] %v242_v46 }
 0x120   :  { %402 = shalt.err (!%p399_p6)
}
 0x121   :  { %s403_s16 = scalar_lea.hbm %s516_s3, 128 }
 0x122   :  { %p404_p7 = scmp.ne.s32.totalorder %s516_s3, %s403_s16  ;;  %p407_p8 = scmp.lt.u32.totalorder %s403_s16, %s516_s3 }
 0x124   :  { %p409_p9 = pnand %p407_p8, %p404_p7 }
 0x126   :  { %412 = shalt.err (!%p409_p9)
}
 0x127   :  { %255 = dma.vmem_to_hbm [thread:$0]  %s253_s12, 128, %s516_s3, [#allocation5]  }
 0x128   :  { %417 = dma.done.wait [#allocation5], 128  }
 0x129   :  { %418 = vsyncadd [#allocation5], 4294967168 }
 0x12a   :  { %259 = vsyncpa [#allocation4], 1 }
 0x12b   :  { %260 = vsyncpa [#allocation7], 1 }
 0x12c   :  { %261 = vsyncpa [#allocation5], 1 }

// kernel: tpu_custom_call.1
= control target key start
LH: loop header
LB: loop body
LE: loop exit
PB: predicated region body
PF: predicated region fallthrough
CT: control target
= control target key end

     0   :  { %8 = vsyncpa [#allocation4], 0  ;;  %s513_s0 = inlined_call_operand.hbm [shape: f32[8,16,128], index: 0, kind: input, shape index: {}]   ;;  %s514_s1 = inlined_call_operand.hbm [shape: f32[128,128], index: 1, kind: input, shape index: {}]   ;;  %s515_s2 = inlined_call_operand.vmem [shape: f32[1,128], index: 2, kind: input, shape index: {}]   ;;  %s516_s3 = inlined_call_operand.hbm [shape: f32[8,128], index: 3, kind: output, shape index: {}]  }
   0x1   :  { %9 = vsyncpa [#allocation7], 0 }
   0x2   :  { %10 = vsyncpa [#allocation5], 0  ;;  %s419_s12 = smov [#allocation3]   ;;  %s347_s16 = scalar_lea.hbm %s513_s0, 2048 }
   0x3   :  { %s16_s13 = sshll.u32 %s419_s12, 4  ;;  %p348_p0 = scmp.ne.s32.totalorder %s513_s0, %s347_s16  ;;  %s17_s13 = int_to_ptr.vmem [resolvable:$true] %s16_s13 }
   0x4   :  { %p351_p1 = scmp.lt.u32.totalorder %s347_s16, %s513_s0 }
   0x6   :  { %p353_p2 = pnand %p351_p1, %p348_p0 }
   0x8   :  { %356 = shalt.err (!%p353_p2)
}
   0x9   :  { %s357_s21 = scalar_lea.vmem %s17_s13, 2048  ;;  %p362_p4 = scmp.lt.s32.totalorder %s17_s13, %s17_s13 }
   0xa   :  { %p358_p3 = scmp.ne.s32.totalorder %s17_s13, %s357_s21  ;;  %p363_p5 = scmp.lt.s32.totalorder %s357_s21, %s357_s21 }
   0xc   :  { %p364_p6 = por %p363_p5, %p362_p4 }
   0xe   :  { %p365_p7 = pnand %p364_p6, %p358_p3 }
  0x10   :  { %368 = shalt.err (!%p365_p7)
}
  0x11   :  { %s420_s22 = smov 128   ;;  %s421_s23 = smov 8  }
  0x12   :  { %22 = dma.hbm_to_vmem [thread:$0]  %s513_s0, 2048, %s17_s13, [#allocation4], %s420_s22, %s420_s22, %s421_s23  }
  0x13   :  { %s422_s26 = smov [#allocation6]   ;;  %s369_s30 = scalar_lea.hbm %s514_s1, 2048 }
  0x14   :  { %s28_s27 = sshll.u32 %s422_s26, 4  ;;  %p370_p8 = scmp.ne.s32.totalorder %s514_s1, %s369_s30  ;;  %s29_s27 = int_to_ptr.vmem [resolvable:$true] %s28_s27 }
  0x15   :  { %p373_p9 = scmp.lt.u32.totalorder %s369_s30, %s514_s1 }
  0x17   :  { %p375_p10 = pnand %p373_p9, %p370_p8 }
  0x19   :  { %378 = shalt.err (!%p375_p10)
}
  0x1a   :  { %s379_s8 = scalar_lea.vmem %s29_s27, 2048  ;;  %p384_p12 = scmp.lt.s32.totalorder %s29_s27, %s29_s27 }
  0x1b   :  { %p380_p11 = scmp.ne.s32.totalorder %s29_s27, %s379_s8  ;;  %p385_p13 = scmp.lt.s32.totalorder %s379_s8, %s379_s8 }
  0x1d   :  { %p386_p0 = por %p385_p13, %p384_p12 }
  0x1f   :  { %p387_p1 = pnand %p386_p0, %p380_p11 }
  0x21   :  { %390 = shalt.err (!%p387_p1)
}
  0x22   :  { %34 = dma.hbm_to_vmem [thread:$0]  %s514_s1, 2048, %s29_s27, [#allocation7], %s420_s22, %s420_s22, %s421_s23  }
  0x23   :  { %413 = dma.done.wait [#allocation4], 2048  }
  0x24   :  { %414 = vsyncadd [#allocation4], 4294965248 }
  0x25   :  { %415 = dma.done.wait [#allocation7], 2048  }
  0x26   :  { %416 = vsyncadd [#allocation7], 4294965248  ;;  %v423_v0 = vmov 0.0|0.0   ;;  %vm424_vm0 = vmmov 0   ;;  %v425_v1 = vmov 0.0   ;;  %v152_v2 = vld [vmem:[#allocation6] sm:$0xff] }
  0x27   :  { %315 = vmatprep.subr.bf16.mxu0 %v423_v0  ;;  %312 = vmatprep.mubr.msk.f32.mxu0 %vm424_vm0, %v425_v1  ;;  %v153_v3 = vld [vmem:[#allocation6 + $0x8] sm:$0xff]  ;;  %v154_v4 = vld [vmem:[#allocation6 + $0x10] sm:$0xff]  ;;  %v155_v6 = vld [vmem:[#allocation6 + $0x18] sm:$0xff]  ;;  %vm129_vm1 = vcmask 1041409   ;;  %vm131_vm2 = vcmask 1042434   ;;  %vm133_vm3 = vcmask 1043459  }
  0x28   :  { %v316_v5 = vpack.c.bf16 %v153_v3, %v152_v2  ;;  %v156_v7 = vld [vmem:[#allocation6 + $0x20] sm:$0xff]  ;;  %v319_v8 = vpack.c.bf16 %v155_v6, %v154_v4  ;;  %v157_v9 = vld [vmem:[#allocation6 + $0x28] sm:$0xff]  ;;  %v158_v10 = vld [vmem:[#allocation6 + $0x30] sm:$0xff]  ;;  %vm135_vm4 = vcmask 1044484   ;;  %vm137_vm5 = vcmask 1045509   ;;  %s426_s11 = smov [#allocation8]  }
  0x29   :  { %v159_v11 = vld [vmem:[#allocation6 + $0x38] sm:$0xff]  ;;  %v473_v12 = vld [vmem:[#allocation6 + $0x40] sm:$0xff]  ;;  %v475_v13 = vld [vmem:[#allocation6 + $0x48] sm:$0xff]  ;;  %v322_v22 = vpack.c.bf16 %v157_v9, %v156_v7  ;;  %vm139_vm6 = vcmask 1046534   ;;  %vm141_vm7 = vcmask 1047559   ;;  %s252_s12 = sshll.u32 %s426_s11, 4  ;;  %s253_s12 = int_to_ptr.vmem [resolvable:$true] %s252_s12 }
  0x2a   :  { %317 = vmatpush3.bf16.msra.mxu0 %v316_v5  ;;  %v477_v14 = vld [vmem:[#allocation6 + $0x50] sm:$0xff]  ;;  %v479_v15 = vld [vmem:[#allocation6 + $0x58] sm:$0xff]  ;;  %v49_v16 = vld [vmem:[#allocation3] sm:$0xff]  ;;  %v325_v27 = vpack.c.bf16 %v159_v11, %v158_v10  ;;  %v328_v34 = vpack.c.bf16 %v475_v13, %v473_v12  ;;  %s391_s13 = scalar_lea.vmem %s253_s12, 128  ;;  %p396_p3 = scmp.lt.s32.totalorder %s253_s12, %s253_s12 }
  0x2b   :  { %318 = vmatprep.subr.bf16.mxu0 %v423_v0  ;;  %v50_v17 = vld [vmem:[#allocation3 + $0x8] sm:$0xff]  ;;  %v51_v18 = vld [vmem:[#allocation3 + $0x10] sm:$0xff]  ;;  %v52_v19 = vld [vmem:[#allocation3 + $0x18] sm:$0xff]  ;;  %v331_v35 = vpack.c.bf16 %v479_v15, %v477_v14  ;;  %p392_p2 = scmp.ne.s32.totalorder %s253_s12, %s391_s13  ;;  %p397_p4 = scmp.lt.s32.totalorder %s391_s13, %s391_s13 }
  0x2c   :  { %v53_v20 = vld [vmem:[#allocation3 + $0x20] sm:$0xff]  ;;  %v65_v21 = vadd.f32 %v50_v17, %v49_v16  ;;  %v54_v23 = vld [vmem:[#allocation3 + $0x28] sm:$0xff]  ;;  %v55_v24 = vld [vmem:[#allocation3 + $0x30] sm:$0xff]  ;;  %v72_v26 = vadd.f32 %v52_v19, %v51_v18 }
  0x2d   :  { %v56_v25 = vld [vmem:[#allocation3 + $0x38] sm:$0xff]  ;;  %v57_v28 = vld [vmem:[#allocation3 + $0x40] sm:$0xff]  ;;  %v58_v29 = vld [vmem:[#allocation3 + $0x48] sm:$0xff]  ;;  %v79_v32 = vadd.f32 %v54_v23, %v53_v20  ;;  %p398_p5 = por %p397_p4, %p396_p3 }
  0x2e   :  { %320 = vmatpush3.bf16.msra.mxu0 %v319_v8  ;;  %v59_v30 = vld [vmem:[#allocation3 + $0x50] sm:$0xff]  ;;  %v66_v31 = vrot.slane %v65_v21, 4  ;;  %v86_v33 = vadd.f32 %v56_v25, %v55_v24  ;;  %v60_v36 = vld [vmem:[#allocation3 + $0x58] sm:$0xff]  ;;  %v61_v37 = vld [vmem:[#allocation3 + $0x60] sm:$0xff]  ;;  %v73_v39 = vrot.slane %v72_v26, 4  ;;  %v93_v40 = vadd.f32 %v58_v29, %v57_v28 }
  0x2f   :  { %321 = vmatprep.subr.bf16.mxu0 %v423_v0  ;;  %v62_v38 = vld [vmem:[#allocation3 + $0x68] sm:$0xff]  ;;  %v63_v41 = vld [vmem:[#allocation3 + $0x70] sm:$0xff]  ;;  %v64_v42 = vld [vmem:[#allocation3 + $0x78] sm:$0xff]  ;;  %v80_v44 = vrot.slane %v79_v32, 4  ;;  %v100_v46 = vadd.f32 %v60_v36, %v59_v30  ;;  %p399_p6 = pnand %p398_p5, %p392_p2 }
  0x30   :  { %v67_v43 = vadd.f32 %v66_v31, %v65_v21  ;;  %v87_v45 = vrot.slane %v86_v33, 4  ;;  %v74_v47 = vadd.f32 %v73_v39, %v72_v26  ;;  %v94_v48 = vrot.slane %v93_v40, 4  ;;  %v165_v23 = vld [vmem:[#allocation6 + $0x68] sm:$0xff]  ;;  %v167_v39 = vld [vmem:[#allocation6 + $0x78] sm:$0xff] }
  0x31   :  { %v107_v49 = vadd.f32 %v62_v38, %v61_v37  ;;  %v114_v50 = vadd.f32 %v64_v42, %v63_v41  ;;  %v81_v52 = vadd.f32 %v80_v44, %v79_v32  ;;  %v101_v54 = vrot.slane %v100_v46, 4  ;;  %v166_v38 = vld [vmem:[#allocation6 + $0x70] sm:$0xff] }
  0x32   :  { %323 = vmatpush3.bf16.msra.mxu0 %v322_v22  ;;  %v68_v51 = vrot.slane %v67_v43, 2  ;;  %v88_v53 = vadd.f32 %v87_v45, %v86_v33  ;;  %v75_v55 = vrot.slane %v74_v47, 2  ;;  %v95_v56 = vadd.f32 %v94_v48, %v93_v40  ;;  %v164_v22 = vld [vmem:[#allocation6 + $0x60] sm:$0xff] }
  0x33   :  { %324 = vmatprep.subr.bf16.mxu0 %v423_v0  ;;  %v108_v57 = vrot.slane %v107_v49, 4  ;;  %v115_v58 = vrot.slane %v114_v50, 4  ;;  %v82_v60 = vrot.slane %v81_v52, 2  ;;  %v102_v62 = vadd.f32 %v101_v54, %v100_v46 }
  0x34   :  { %v69_v59 = vadd.f32 %v68_v51, %v67_v43  ;;  %v89_v61 = vrot.slane %v88_v53, 2  ;;  %v76_v63 = vadd.f32 %v75_v55, %v74_v47  ;;  %v96_v1 = vrot.slane %v95_v56, 2 }
  0x35   :  { %v109_v2 = vadd.f32 %v108_v57, %v107_v49  ;;  %v116_v3 = vadd.f32 %v115_v58, %v114_v50  ;;  %v83_v5 = vadd.f32 %v82_v60, %v81_v52  ;;  %v103_v7 = vrot.slane %v102_v62, 2 }
  0x36   :  { %326 = vmatpush3.bf16.msra.mxu0 %v325_v27  ;;  %v70_v4 = vrot.slane %v69_v59, 1  ;;  %v90_v6 = vadd.f32 %v89_v61, %v88_v53  ;;  %v77_v8 = vrot.slane %v76_v63, 1  ;;  %v97_v9 = vadd.f32 %v96_v1, %v95_v56 }
  0x37   :  { %327 = vmatprep.subr.bf16.mxu0 %v423_v0  ;;  %v110_v10 = vrot.slane %v109_v2, 2  ;;  %v117_v11 = vrot.slane %v116_v3, 2  ;;  %v84_v13 = vrot.slane %v83_v5, 1  ;;  %v104_v17 = vadd.f32 %v103_v7, %v102_v62 }
  0x38   :  { %v71_v12 = vadd.f32 %v70_v4, %v69_v59  ;;  %v91_v16 = vrot.slane %v90_v6, 1  ;;  %v78_v18 = vadd.f32 %v77_v8, %v76_v63  ;;  %v98_v19 = vrot.slane %v97_v9, 1 }
  0x39   :  { %v111_v20 = vadd.f32 %v110_v10, %v109_v2  ;;  %v118_v21 = vadd.f32 %v117_v11, %v116_v3  ;;  %v85_v24 = vadd.f32 %v84_v13, %v83_v5  ;;  %v105_v26 = vrot.slane %v104_v17, 1 }
  0x3a   :  { %329 = vmatpush3.bf16.msra.mxu0 %v328_v34  ;;  %v92_v25 = vadd.f32 %v91_v16, %v90_v6  ;;  %v99_v27 = vadd.f32 %v98_v19, %v97_v9  ;;  %v130_v30 = vsel %vm129_vm1, %v78_v18, %v71_v12  ;;  %v334_v33 = vpack.c.bf16 %v165_v23, %v164_v22 }
  0x3b   :  { %330 = vmatprep.subr.bf16.mxu0 %v423_v0  ;;  %v112_v28 = vrot.slane %v111_v20, 1  ;;  %v119_v29 = vrot.slane %v118_v21, 1  ;;  %v106_v31 = vadd.f32 %v105_v26, %v104_v17  ;;  %v132_v32 = vsel %vm131_vm2, %v85_v24, %v130_v30 }
  0x3c   :  { %v134_v37 = vsel %vm133_vm3, %v92_v25, %v132_v32  ;;  %v337_v43 = vpack.c.bf16 %v167_v39, %v166_v38 }
  0x3d   :  { %v113_v34 = vadd.f32 %v112_v28, %v111_v20  ;;  %v120_v36 = vadd.f32 %v119_v29, %v118_v21  ;;  %v136_v40 = vsel %vm135_vm4, %v99_v27, %v134_v37 }
  0x3e   :  { %332 = vmatpush3.bf16.msra.mxu0 %v331_v35  ;;  %v138_v41 = vsel %vm137_vm5, %v106_v31, %v136_v40  ;;  %v262_v35 = vld [vmem:[%s515_s2] ss:$0 sm:$0xff] }
  0x3f   :  { %333 = vmatprep.subr.bf16.mxu0 %v423_v0  ;;  %v140_v42 = vsel %vm139_vm6, %v113_v34, %v138_v41 }
  0x40   :  { %v142_v44 = vsel %vm141_vm7, %v120_v36, %v140_v42 }
  0x41   :  { %v150_v14 = vmul.f32 0.0625, %v142_v44 }
  0x42   :  { %335 = vmatpush3.bf16.msra.mxu0 %v334_v33 }
  0x43   :  { %336 = vmatprep.subr.bf16.mxu0 %v423_v0  ;;  %v151_v15 = vmax.f32 %v150_v14, 0.0 }
  0x46   :  { %338 = vmatpush3.bf16.msra.mxu0 %v337_v43 }
  0x49   :  { %313 = vmatmul.mubr.f32.vlgmr.msra.gmra.mrb[0].mxu0 %v151_v15 }
 0x11c   :  { %v241_v45 = vpop.f32.mrb[0].mxu0 }
 0x11d   :  { %v242_v46 = vadd.f32 %v262_v35, %v241_v45  ;;  %v314_v47 = vpop.f32.mrb[1].mxu0 }
 0x11f   :  { %245 = vst [vmem:[#allocation8] sm:$0xff] %v242_v46 }
 0x120   :  { %402 = shalt.err (!%p399_p6)
}
 0x121   :  { %s403_s16 = scalar_lea.hbm %s516_s3, 128 }
 0x122   :  { %p404_p7 = scmp.ne.s32.totalorder %s516_s3, %s403_s16  ;;  %p407_p8 = scmp.lt.u32.totalorder %s403_s16, %s516_s3 }
 0x124   :  { %p409_p9 = pnand %p407_p8, %p404_p7 }
 0x126   :  { %412 = shalt.err (!%p409_p9)
}
 0x127   :  { %255 = dma.vmem_to_hbm [thread:$0]  %s253_s12, 128, %s516_s3, [#allocation5]  }
 0x128   :  { %417 = dma.done.wait [#allocation5], 128  }
 0x129   :  { %418 = vsyncadd [#allocation5], 4294967168 }
 0x12a   :  { %259 = vsyncpa [#allocation4], 1 }
 0x12b   :  { %260 = vsyncpa [#allocation7], 1 }
 0x12c   :  { %261 = vsyncpa [#allocation5], 1 }

</bundles_post_ra>
